<compile_context>
chip_gen: v7x
topology: tpu7x:2x2x1
jax: 0.10.0
libtpu: 0.0.40
codegen_flags: <defaults>
</compile_context>

<pallas_src>
import math

import jax
import jax.numpy as jnp
from jax.experimental import pallas as pl
from jax.experimental.pallas import tpu as pltpu

_TILE_BUDGET_BYTES = 8 << 20          # per output pipeline buffer (x2 buffered)
_PATTERN_MAX_BYTES = 512 << 10        # std pattern kept tiny vs. the output
_VMEM_LIMIT_BYTES = 32 * 1024 * 1024  # v7x-safe scoped VMEM limit
_LANE_WIDTHS = (2048, 1024, 512, 256, 128)


def _compiler_params():
    return pltpu.CompilerParams(
        dimension_semantics=("parallel",),
        vmem_limit_bytes=_VMEM_LIMIT_BYTES,
    )


def _sublane_packing(dtype) -> int:
    """Rows per native sublane tile for this dtype: 8 f32 / 16 bf16 / 32 int8."""
    return max(8, 32 // jnp.dtype(dtype).itemsize)


def _flat_plan(B, A, dtype):
    """Pick (W, q) for the lane-dense flat path, or None to use the (B, A) path."""
    total = B * A
    itemsize = jnp.dtype(dtype).itemsize
    s = _sublane_packing(dtype)
    for W in _LANE_WIDTHS:
        if total % W != 0:
            continue
        period = A // math.gcd(A, W)      # pattern period in slab rows
        q = math.lcm(period, s)           # row quantum: period- and sublane-aligned
        if q * W * itemsize > _PATTERN_MAX_BYTES:
            continue                      # pattern too big; try narrower lanes
        return W, q
    return None


def _flat_std_kernel(pat_ref, out_ref):
    """Broadcast-store: tile the periodic std pattern across the output tile."""
    pat = pat_ref[...]
    reps = out_ref.shape[0] // pat_ref.shape[0]   # static; tile_r is a multiple of q
    out_ref[...] = pat if reps == 1 else jnp.tile(pat, (reps, 1))


def _natural_std_kernel(row_ref, out_ref):
    out_ref[...] = jnp.broadcast_to(row_ref[...], out_ref.shape)


def _std_flat(std_vec, B, A, W, q, dtype):
    """Lane-dense path: write std as a (B*A/W, W) slab; reshape back is free."""
    rows = (B * A) // W
    itemsize = jnp.dtype(dtype).itemsize
    # q*W is a multiple of A, so this (q, W) block is valid at every tile offset.
    pat = jnp.tile(std_vec, (q * W) // A).reshape(q, W).astype(dtype)

    budget_q = max(1, _TILE_BUDGET_BYTES // (q * W * itemsize))
    n_q = pl.cdiv(rows, q)                            # quanta of work
    tile_q = max(1, min(budget_q, pl.cdiv(n_q, 2)))   # >=2 grid steps when possible
    tile_r = tile_q * q
    grid = (pl.cdiv(rows, tile_r),)

    out = pl.pallas_call(
        _flat_std_kernel,
        out_shape=jax.ShapeDtypeStruct((rows, W), dtype),
        grid_spec=pl.GridSpec(
            grid=grid,
            in_specs=[pl.BlockSpec((q, W), lambda i: (0, 0))],      # fetched once
            out_specs=pl.BlockSpec((tile_r, W), lambda i: (i, 0)),
        ),
        compiler_params=_compiler_params(),
    )(pat)
    return out.reshape(B, A)   # contiguous row-major reshape: no data movement


def _std_natural(std_vec, B, A, dtype):
    """Fallback path when B*A is not a multiple of 128: (tile_b, A) blocks."""
    row = std_vec.astype(dtype).reshape(1, A)
    itemsize = jnp.dtype(dtype).itemsize
    s = _sublane_packing(dtype)
    if B <= s:
        tile_b = B                                    # full-dim block: always legal
    else:
        a_pad = pl.cdiv(A, 128) * 128                 # VMEM lane padding
        budget_b = max(s, (_TILE_BUDGET_BYTES // (a_pad * itemsize)) // s * s)
        target_b = pl.cdiv(pl.cdiv(B, 2), s) * s      # >=2 grid steps, packing-aligned
        tile_b = max(s, min(budget_b, target_b))
    grid = (pl.cdiv(B, tile_b),)

    return pl.pallas_call(
        _natural_std_kernel,
        out_shape=jax.ShapeDtypeStruct((B, A), dtype),
        grid_spec=pl.GridSpec(
            grid=grid,
            in_specs=[pl.BlockSpec((1, A), lambda i: (0, 0))],
            out_specs=pl.BlockSpec((tile_b, A), lambda i: (i, 0)),
        ),
        compiler_params=_compiler_params(),
    )(row)


def gaussian_forward(action_mean: jax.Array, log_std: jax.Array):
    """action_mean: (B, A); log_std: (A,) -> (action_mean, std broadcast to (B, A))."""
    B, A = action_mean.shape
    dtype = action_mean.dtype
    # exp on the tiny (A,) parameter is hoisted out of the kernel (review item):
    # the kernel is the broadcast-store that dominates this op.
    std_vec = jnp.exp(log_std.astype(jnp.float32))
    plan = _flat_plan(B, A, dtype)
    if plan is not None:
        std = _std_flat(std_vec, B, A, plan[0], plan[1], dtype)
    else:
        std = _std_natural(std_vec, B, A, dtype)
    # Mean is an identity pass-through: return the input, no kernel copy.
    return action_mean, std


class Gaussian:
    """Minimal JAX mirror of the PyTorch Gaussian module's forward()."""

    def __init__(self, action_dim: int, init_std: float = 1.0):
        # PyTorch draws randn(action_dim) then immediately overwrites it with
        # log(init_std) via self.std.set(...), so the parameter is deterministic.
        self.log_std = jnp.full((action_dim,), math.log(init_std), dtype=jnp.float32)

    def forward(self, action_mean: jax.Array):
        return gaussian_forward(action_mean, self.log_std)


if __name__ == "__main__":
    def _check(B, A, dtype, init_std, key):
        mean = jax.random.normal(key, (B, A), dtype=jnp.float32).astype(dtype)
        g = Gaussian(action_dim=A, init_std=init_std)
        m, s = g.forward(mean)
        jax.block_until_ready((m, s))
        ref = jnp.broadcast_to(jnp.exp(g.log_std)[None, :].astype(dtype), (B, A))
        assert m.shape == (B, A) and s.shape == (B, A)
        assert jnp.allclose(m.astype(jnp.float32), mean.astype(jnp.float32), atol=1e-6)
        assert jnp.allclose(s.astype(jnp.float32), ref.astype(jnp.float32),
                            atol=1e-6, rtol=1e-6)

    key = jax.random.PRNGKey(0)
    keys = jax.random.split(key, 5)
    _check(2,   4,   jnp.float32,  1.0, keys[0])   # tiny -> natural (B, A) path
    _check(256, 4,   jnp.float32,  0.3, keys[1])   # flat path, W=1024, single tile
    _check(544, 4,   jnp.float32,  0.7, keys[2])   # flat path, W=128, 2 tiles + edge
    _check(32,  200, jnp.float32,  1.5, keys[3])   # flat path, periodic pattern P=25
    _check(48,  12,  jnp.bfloat16, 0.5, keys[4])   # natural path, bf16 sublane packing

    print("KERNEL_OK")
</pallas_src>

<mosaic_0001>
module attributes {stable_mosaic.version = 11 : i64} {
  func.func @_natural_std_kernel(%arg0: i32, %arg1: memref<1x4xf32, #tpu.memory_space<vmem>>, %arg2: memref<2x4xf32, #tpu.memory_space<vmem>>) attributes {dimension_semantics = [#tpu.dimension_semantics<parallel>], iteration_bounds = array<i64: 1>, scalar_prefetch = 0 : i64, scratch_operands = 0 : i64, tpu.core_type = #tpu.core_type<tc>, window_params = [{pipeline_mode = #tpu.pipeline_mode<synchronous>, transform_indices = @transform_0, window_bounds = array<i64: 1, 4>}, {transform_indices = @transform_1, window_bounds = array<i64: 2, 4>}]} {
    %c0 = arith.constant 0 : index
    %c0_0 = arith.constant 0 : index
    %0 = vector.load %arg1[%c0, %c0_0] : memref<1x4xf32, #tpu.memory_space<vmem>>, vector<1x4xf32>
    %1 = vector.shape_cast %0 : vector<1x4xf32> to vector<1x4xf32>
    %2 = vector.broadcast %1 : vector<1x4xf32> to vector<2x4xf32>
    %c0_1 = arith.constant 0 : index
    %c0_2 = arith.constant 0 : index
    %3 = vector.load %arg2[%c0_1, %c0_2] : memref<2x4xf32, #tpu.memory_space<vmem>>, vector<2x4xf32>
    tpu.vector_store %arg2[%c0_1, %c0_2], %2 {strides = array<i32>} : memref<2x4xf32, #tpu.memory_space<vmem>>, vector<2x4xf32>,
    return
  }
  func.func @transform_0(%arg0: i32) -> (i32, i32) {
    %c0_i32 = arith.constant 0 : i32
    %c0_i32_0 = arith.constant 0 : i32
    %c0_i32_1 = arith.constant 0 : i32
    return %c0_i32, %c0_i32_0 : i32, i32
  }
  func.func @transform_1(%arg0: i32) -> (i32, i32) {
    %c0_i32 = arith.constant 0 : i32
    %c0_i32_0 = arith.constant 0 : i32
    return %arg0, %c0_i32 : i32, i32
  }
}

</mosaic_0001>

<bundles_post_ra>
// kernel: tpu_custom_call.1
= control target key start
LH: loop header
LB: loop body
LE: loop exit
PB: predicated region body
PF: predicated region fallthrough
CT: control target
= control target key end

     0   :  { %6 = vsyncpa [#allocation3], 0  ;;  %s132_s0 = inlined_call_operand.hbm [shape: f32[1,4], index: 0, kind: input, shape index: {}]   ;;  %s133_s1 = inlined_call_operand.hbm [shape: f32[2,4], index: 1, kind: output, shape index: {}]  }
   0x1   :  { %7 = vsyncpa [#allocation4], 0  ;;  %s96_s6 = smov [#allocation2]   ;;  %s48_s10 = scalar_lea.hbm %s132_s0, 16 }
   0x2   :  { %s14_s7 = sshll.u32 %s96_s6, 4  ;;  %p49_p0 = scmp.ne.s32.totalorder %s132_s0, %s48_s10  ;;  %s15_s7 = int_to_ptr.vmem [resolvable:$true] %s14_s7 }
   0x3   :  { %p52_p1 = scmp.lt.u32.totalorder %s48_s10, %s132_s0 }
   0x5   :  { %p54_p2 = pnand %p52_p1, %p49_p0 }
   0x7   :  { %57 = shalt.err (!%p54_p2)
}
   0x8   :  { %s58_s15 = scalar_lea.vmem %s15_s7, 16  ;;  %s62_s16 = scalar_lea.vmem %s15_s7, 32 }
   0x9   :  { %p59_p3 = scmp.ne.s32.totalorder %s15_s7, %s58_s15  ;;  %p63_p4 = scmp.lt.s32.totalorder %s15_s7, %s15_s7 }
   0xa   :  { %p64_p5 = scmp.lt.s32.totalorder %s62_s16, %s58_s15 }
   0xc   :  { %p65_p6 = por %p64_p5, %p63_p4 }
   0xe   :  { %p66_p7 = pnand %p65_p6, %p59_p3 }
  0x10   :  { %69 = shalt.err (!%p66_p7)
}
  0x11   :  { %17 = dma.hbm_to_vmem [thread:$0]  %s132_s0, 16, %s15_s7, [#allocation3]  }
  0x12   :  { %92 = dma.done.wait [#allocation3], 16  }
  0x13   :  { %93 = vsyncadd [#allocation3], 4294967280  ;;  %s97_s19 = smov [#allocation5]   ;;  %vm28_vm0 = vcmask 25600   ;;  %v45_v0 = vld [vmem:[#allocation2] ss:$0 sm:$0xff] }
  0x14   :  { %s36_s20 = sshll.u32 %s97_s19, 4  ;;  %29 = vst.msk [vmem:[#allocation5] sm:$0x3] %vm28_vm0, %v45_v0  ;;  %s37_s20 = int_to_ptr.vmem [resolvable:$true] %s36_s20 }
  0x15   :  { %s70_s21 = scalar_lea.vmem %s37_s20, 32  ;;  %p75_p9 = scmp.lt.s32.totalorder %s37_s20, %s37_s20 }
  0x16   :  { %p71_p8 = scmp.ne.s32.totalorder %s37_s20, %s70_s21  ;;  %p76_p10 = scmp.lt.s32.totalorder %s70_s21, %s70_s21 }
  0x18   :  { %p77_p11 = por %p76_p10, %p75_p9 }
  0x1a   :  { %p78_p12 = pnand %p77_p11, %p71_p8 }
  0x1c   :  { %81 = shalt.err (!%p78_p12)
}
  0x1d   :  { %s82_s24 = scalar_lea.hbm %s133_s1, 32 }
  0x1e   :  { %p83_p13 = scmp.ne.s32.totalorder %s133_s1, %s82_s24  ;;  %p86_p0 = scmp.lt.u32.totalorder %s82_s24, %s133_s1 }
  0x20   :  { %p88_p1 = pnand %p86_p0, %p83_p13 }
  0x22   :  { %91 = shalt.err (!%p88_p1)
}
  0x23   :  { %39 = dma.vmem_to_hbm [thread:$0]  %s37_s20, 32, %s133_s1, [#allocation4]  }
  0x24   :  { %94 = dma.done.wait [#allocation4], 32  }
  0x25   :  { %95 = vsyncadd [#allocation4], 4294967264 }
  0x26   :  { %43 = vsyncpa [#allocation3], 1 }
  0x27   :  { %44 = vsyncpa [#allocation4], 1 }

</bundles_post_ra>
